<compile_context>
chip_gen: v5e
topology: v5e:2x2
jax: 0.10.0
libtpu: 0.0.40
codegen_flags: <defaults>
</compile_context>

<pallas_src>
import functools
import math

import jax
import jax.numpy as jnp
from jax.experimental import pallas as pl
from jax.experimental.pallas import tpu as pltpu


def _tsa_kernel(x_ref, w_ref, b_ref, out_ref, *, hidden, scale):
    """One grid step: (BT, T, F) block of the batch, full fused weights."""
    bt, t, f = x_ref.shape

    # Fused q/k/v projection: one big (BT*T, F) @ (F, 3H) bf16 matmul, f32 acc.
    x2d = x_ref[...].reshape(bt * t, f)                                   # bf16
    qkv = jnp.dot(x2d, w_ref[...], preferred_element_type=jnp.float32)    # (BT*T, 3H) f32
    qkv = (qkv + b_ref[...]).reshape(bt, t, 3 * hidden)

    q = qkv[:, :, :hidden]
    k = qkv[:, :, hidden:2 * hidden]
    v = qkv[:, :, 2 * hidden:]

    # Batched attention scores (per batch element), f32 accumulation.
    s = jnp.einsum("btd,bsd->bts",
                   q.astype(jnp.bfloat16), k.astype(jnp.bfloat16),
                   preferred_element_type=jnp.float32) * scale            # (BT, T, T)

    # Segmented softmax over the last (lane) axis -> never mixes batches.
    m = jnp.max(s, axis=-1, keepdims=True)
    e = jnp.exp(s - m)
    p = e * pl.reciprocal(jnp.sum(e, axis=-1, keepdims=True), approx=True)

    o = jnp.einsum("bts,bsd->btd",
                   p.astype(jnp.bfloat16), v.astype(jnp.bfloat16),
                   preferred_element_type=jnp.float32)                    # (BT, T, H)
    out_ref[...] = o.astype(out_ref.dtype)


def _pick_batch_tile(batch, seq, in_f, hid, row_target=256, vmem_budget=16 << 20):
    """Largest divisor of `batch` whose block keeps >=row_target MXU rows goal
    without blowing the VMEM budget (x bf16 + out f32, double-buffered)."""
    best = 1
    for d in range(1, batch + 1):
        if batch % d:
            continue
        rows = d * seq
        blk_bytes = 2 * (d * seq * in_f * 2) + 2 * (d * seq * hid * 4)
        if blk_bytes > vmem_budget:
            continue
        if rows <= max(row_target, seq):
            best = d
    return best


def temporal_self_attention(x, params, hidden_size):
    """Pallas forward of TemporalSelfAttention_obj.

    x: (B, T, F) float32
    params: PyTorch nn.Linear convention:
       wq/wk/wv: (H, F), bq/bk/bv: (H,)
    """
    B, T, F = x.shape
    H = hidden_size

    # Fuse q/k/v weights into one (F, 3H) bf16 matrix (kernel computes x @ W).
    w_qkv = jnp.concatenate(
        [params["wq"].T, params["wk"].T, params["wv"].T], axis=1
    ).astype(jnp.bfloat16)                                                # (F, 3H)
    b_qkv = jnp.concatenate(
        [params["bq"], params["bk"], params["bv"]]
    ).reshape(1, 3 * H).astype(jnp.float32)                               # (1, 3H)

    x_bf = x.astype(jnp.bfloat16)   # halve HBM traffic for the feature stream

    BT = _pick_batch_tile(B, T, F, H)
    grid = (B // BT,)

    x_spec = pl.BlockSpec((BT, T, F), lambda b: (b, 0, 0))
    w_spec = pl.BlockSpec(w_qkv.shape, lambda b: (0, 0))     # grid-invariant
    b_spec = pl.BlockSpec(b_qkv.shape, lambda b: (0, 0))     # grid-invariant
    out_spec = pl.BlockSpec((BT, T, H), lambda b: (b, 0, 0))

    grid_spec = pltpu.PrefetchScalarGridSpec(
        num_scalar_prefetch=0,
        grid=grid,
        in_specs=[x_spec, w_spec, b_spec],
        out_specs=out_spec,
    )

    kernel = functools.partial(_tsa_kernel, hidden=H, scale=1.0 / math.sqrt(H))

    return pl.pallas_call(
        kernel,
        out_shape=jax.ShapeDtypeStruct((B, T, H), x.dtype),
        grid_spec=grid_spec,
        compiler_params=pltpu.CompilerParams(
            dimension_semantics=("parallel",),
            vmem_limit_bytes=48 * 1024 * 1024,
        ),
    )(x_bf, w_qkv, b_qkv)


def _reference(x, params, hidden_size):
    """Pure-JAX f32 reference mirroring the PyTorch forward."""
    q = x @ params["wq"].T + params["bq"]
    k = x @ params["wk"].T + params["bk"]
    v = x @ params["wv"].T + params["bv"]
    s = jnp.einsum("btd,bsd->bts", q, k) / math.sqrt(hidden_size)
    a = jax.nn.softmax(s, axis=-1)
    return jnp.einsum("bts,bsd->btd", a, v)


def _init_params(key, input_size, hidden_size):
    # PyTorch nn.Linear-style uniform(-1/sqrt(fan_in), 1/sqrt(fan_in)).
    ks = jax.random.split(key, 6)
    bound = 1.0 / math.sqrt(input_size)

    def u(k, shape):
        return jax.random.uniform(k, shape, jnp.float32, -bound, bound)

    return {
        "wq": u(ks[0], (hidden_size, input_size)),
        "bq": u(ks[1], (hidden_size,)),
        "wk": u(ks[2], (hidden_size, input_size)),
        "bk": u(ks[3], (hidden_size,)),
        "wv": u(ks[4], (hidden_size, input_size)),
        "bv": u(ks[5], (hidden_size,)),
    }


if __name__ == "__main__":
    B, T, F, H = 2, 8, 64, 32      # batch, num_frames, input_size, hidden_size
    key = jax.random.PRNGKey(0)
    k_x, k_p = jax.random.split(key)

    x = jax.random.normal(k_x, (B, T, F), jnp.float32)
    params = _init_params(k_p, F, H)

    out = temporal_self_attention(x, params, H)
    out = jax.block_until_ready(out)

    ref = _reference(x, params, H)
    assert out.shape == (B, T, H)
    # bf16 MXU operands (f32 accumulation) -> compare with a loosened tolerance.
    assert jnp.allclose(out, ref, atol=2e-2, rtol=2e-2), "mismatch vs pure-JAX reference"

    print("KERNEL_OK")
</pallas_src>

<mosaic_0001>
module attributes {stable_mosaic.version = 11 : i64} {
  func.func @_tsa_kernel(%arg0: i32, %arg1: memref<2x8x64xbf16, #tpu.memory_space<vmem>>, %arg2: memref<64x96xbf16, #tpu.memory_space<vmem>>, %arg3: memref<1x96xf32, #tpu.memory_space<vmem>>, %arg4: memref<2x8x32xf32, #tpu.memory_space<vmem>>) attributes {dimension_semantics = [#tpu.dimension_semantics<parallel>], iteration_bounds = array<i64: 1>, scalar_prefetch = 0 : i64, scratch_operands = 0 : i64, tpu.core_type = #tpu.core_type<tc>, window_params = [{transform_indices = @transform_0, window_bounds = array<i64: 2, 8, 64>}, {pipeline_mode = #tpu.pipeline_mode<synchronous>, transform_indices = @transform_1, window_bounds = array<i64: 64, 96>}, {pipeline_mode = #tpu.pipeline_mode<synchronous>, transform_indices = @transform_2, window_bounds = array<i64: 1, 96>}, {transform_indices = @transform_3, window_bounds = array<i64: 2, 8, 32>}]} {
    %c0 = arith.constant 0 : index
    %c0_0 = arith.constant 0 : index
    %c0_1 = arith.constant 0 : index
    %0 = vector.load %arg1[%c0, %c0_0, %c0_1] : memref<2x8x64xbf16, #tpu.memory_space<vmem>>, vector<2x8x64xbf16>
    %1 = vector.shape_cast %0 : vector<2x8x64xbf16> to vector<16x64xbf16>
    %c0_2 = arith.constant 0 : index
    %c0_3 = arith.constant 0 : index
    %2 = vector.load %arg2[%c0_2, %c0_3] : memref<64x96xbf16, #tpu.memory_space<vmem>>, vector<64x96xbf16>
    %cst = arith.constant dense<0.000000e+00> : vector<16x96xf32>
    %3 = tpu.matmul %1, %2, %cst {dimension_numbers = #tpu.dot_dimension_numbers<[1], [0], [0], [1], [0, 0, 1, 1], [], []>} : vector<16x64xbf16>, vector<64x96xbf16>, vector<16x96xf32> -> vector<16x96xf32>
    %c0_4 = arith.constant 0 : index
    %c0_5 = arith.constant 0 : index
    %4 = vector.load %arg3[%c0_4, %c0_5] : memref<1x96xf32, #tpu.memory_space<vmem>>, vector<1x96xf32>
    %5 = vector.broadcast %4 : vector<1x96xf32> to vector<16x96xf32>
    %6 = arith.addf %3, %5 : vector<16x96xf32>
    %7 = vector.shape_cast %6 : vector<16x96xf32> to vector<2x8x96xf32>
    %8 = vector.extract_strided_slice %7 {offsets = [0, 0, 0], sizes = [2, 8, 32], strides = [1, 1, 1]} : vector<2x8x96xf32> to vector<2x8x32xf32>
    %9 = vector.extract_strided_slice %7 {offsets = [0, 0, 32], sizes = [2, 8, 32], strides = [1, 1, 1]} : vector<2x8x96xf32> to vector<2x8x32xf32>
    %10 = vector.extract_strided_slice %7 {offsets = [0, 0, 64], sizes = [2, 8, 32], strides = [1, 1, 1]} : vector<2x8x96xf32> to vector<2x8x32xf32>
    %11 = arith.truncf %8 : vector<2x8x32xf32> to vector<2x8x32xbf16>
    %12 = arith.truncf %9 : vector<2x8x32xf32> to vector<2x8x32xbf16>
    "tpu.trace_start"() <{level = 10 : i32, message = "btd,bsd->bts"}> : () -> ()
    %cst_6 = arith.constant dense<0.000000e+00> : vector<2x8x8xf32>
    %13 = tpu.matmul %11, %12, %cst_6 {dimension_numbers = #tpu.dot_dimension_numbers<[2], [2], [1], [1], [0, 0, 0, 1, 1, 1], [0], [0]>} : vector<2x8x32xbf16>, vector<2x8x32xbf16>, vector<2x8x8xf32> -> vector<2x8x8xf32>
    "tpu.trace_stop"() : () -> ()
    %cst_7 = arith.constant 0.176776692 : f32
    %14 = vector.broadcast %cst_7 : f32 to vector<2x8x8xf32>
    %15 = arith.mulf %13, %14 : vector<2x8x8xf32>
    %cst_8 = arith.constant dense<0xFF800000> : vector<2x8xf32>
    %16 = vector.multi_reduction <maximumf>, %15, %cst_8 [2] : vector<2x8x8xf32> to vector<2x8xf32>
    %17 = vector.shape_cast %16 : vector<2x8xf32> to vector<2x8x1xf32>
    %18 = vector.broadcast %17 : vector<2x8x1xf32> to vector<2x8x8xf32>
    %19 = arith.subf %15, %18 : vector<2x8x8xf32>
    %20 = math.exp %19 : vector<2x8x8xf32>
    %cst_9 = arith.constant dense<0.000000e+00> : vector<2x8xf32>
    %21 = vector.multi_reduction <add>, %20, %cst_9 [2] : vector<2x8x8xf32> to vector<2x8xf32>
    %22 = vector.shape_cast %21 : vector<2x8xf32> to vector<2x8x1xf32>
    %23 = tpu.reciprocal %22 {approx = true} : vector<2x8x1xf32> -> vector<2x8x1xf32>
    %24 = vector.broadcast %23 : vector<2x8x1xf32> to vector<2x8x8xf32>
    %25 = arith.mulf %20, %24 : vector<2x8x8xf32>
    %26 = arith.truncf %25 : vector<2x8x8xf32> to vector<2x8x8xbf16>
    %27 = arith.truncf %10 : vector<2x8x32xf32> to vector<2x8x32xbf16>
    "tpu.trace_start"() <{level = 10 : i32, message = "bts,bsd->btd"}> : () -> ()
    %cst_10 = arith.constant dense<0.000000e+00> : vector<2x8x32xf32>
    %28 = tpu.matmul %26, %27, %cst_10 {dimension_numbers = #tpu.dot_dimension_numbers<[2], [1], [1], [2], [0, 0, 0, 1, 1, 2], [0], [0]>} : vector<2x8x8xbf16>, vector<2x8x32xbf16>, vector<2x8x32xf32> -> vector<2x8x32xf32>
    "tpu.trace_stop"() : () -> ()
    %c0_11 = arith.constant 0 : index
    %c0_12 = arith.constant 0 : index
    %c0_13 = arith.constant 0 : index
    %29 = vector.load %arg4[%c0_11, %c0_12, %c0_13] : memref<2x8x32xf32, #tpu.memory_space<vmem>>, vector<2x8x32xf32>
    tpu.vector_store %arg4[%c0_11, %c0_12, %c0_13], %28 {strides = array<i32>} : memref<2x8x32xf32, #tpu.memory_space<vmem>>, vector<2x8x32xf32>,
    return
  }
  func.func @transform_0(%arg0: i32) -> (i32, i32, i32) {
    %c0_i32 = arith.constant 0 : i32
    %c0_i32_0 = arith.constant 0 : i32
    %c0_i32_1 = arith.constant 0 : i32
    return %arg0, %c0_i32, %c0_i32_0 : i32, i32, i32
  }
  func.func @transform_1(%arg0: i32) -> (i32, i32) {
    %c0_i32 = arith.constant 0 : i32
    %c0_i32_0 = arith.constant 0 : i32
    %c0_i32_1 = arith.constant 0 : i32
    return %c0_i32, %c0_i32_0 : i32, i32
  }
  func.func @transform_2(%arg0: i32) -> (i32, i32) {
    %c0_i32 = arith.constant 0 : i32
    %c0_i32_0 = arith.constant 0 : i32
    %c0_i32_1 = arith.constant 0 : i32
    return %c0_i32, %c0_i32_0 : i32, i32
  }
  func.func @transform_3(%arg0: i32) -> (i32, i32, i32) {
    %c0_i32 = arith.constant 0 : i32
    %c0_i32_0 = arith.constant 0 : i32
    %c0_i32_1 = arith.constant 0 : i32
    return %arg0, %c0_i32, %c0_i32_0 : i32, i32, i32
  }
}

</mosaic_0001>

<bundles_post_ra>
// kernel: tpu_custom_call.1
= control target key start
LH: loop header
LB: loop body
LE: loop exit
PB: predicated region body
PF: predicated region fallthrough
CT: control target
= control target key end

     0   :  { %8 = vsyncpa [#allocation3], 0  ;;  %s435_s0 = inlined_call_operand.hbm [shape: bf16[2,8,64], index: 0, kind: input, shape index: {}]   ;;  %s436_s1 = inlined_call_operand.hbm [shape: bf16[64,96], index: 1, kind: input, shape index: {}]   ;;  %s437_s2 = inlined_call_operand.vmem [shape: f32[1,96], index: 2, kind: input, shape index: {}]   ;;  %s438_s3 = inlined_call_operand.hbm [shape: f32[2,8,32], index: 3, kind: output, shape index: {}]  }
   0x1   :  { %9 = vsyncpa [#allocation6], 0 }
   0x2   :  { %10 = vsyncpa [#allocation4], 0  ;;  %s15_s14 = sshll.u32 %s435_s0, 4  ;;  %s377_s15 = smov [#allocation2]   ;;  %s16_s14 = int_to_ptr.hbm [resolvable:$true] %s15_s14 }
   0x3   :  { %s17_s16 = sshll.u32 %s377_s15, 4  ;;  %s28_s19 = sshll.u32 %s436_s1, 4  ;;  %s18_s16 = int_to_ptr.vmem [resolvable:$true] %s17_s16  ;;  %s29_s19 = int_to_ptr.hbm [resolvable:$true] %s28_s19 }
   0x4   :  { %s378_s20 = smov 64   ;;  %s379_s21 = smov 4  }
   0x5   :  { %23 = dma.hbm_to_vmem [thread:$0]  %s16_s14, 128, %s18_s16, [#allocation3], %s378_s20, %s378_s20, %s379_s21  }
   0x6   :  { %s380_s22 = smov [#allocation5]  }
   0x7   :  { %s30_s23 = sshll.u32 %s380_s22, 4  ;;  %s31_s23 = int_to_ptr.vmem [resolvable:$true] %s30_s23 }
   0x8   :  { %36 = dma.hbm_to_vmem [thread:$0]  %s29_s19, 512, %s31_s23, [#allocation6], %s378_s20, %s378_s20, %s379_s21  }
   0x9   :  { %371 = dma.done.wait [#allocation3], 128  }
   0xa   :  { %372 = vsyncadd [#allocation3], 4294967168 }
   0xb   :  { %373 = dma.done.wait [#allocation6], 512  }
   0xc   :  { %374 = vsyncadd [#allocation6], 4294966784  ;;  %v281_v0 = vld [vmem:[#allocation5 + $0x18] sm:$0xff]  ;;  %v280_v1 = vld [vmem:[#allocation5 + $0x10] sm:$0xff]  ;;  %vm91_vm0 = vcmask 523264   ;;  %s381_s24 = smov 96  }
   0xd   :  { %99 = vmatpush.bf16.msra.mxu0 %v281_v0  ;;  %v279_v2 = vld [vmem:[#allocation5 + $0x8] sm:$0xff]  ;;  %v278_v3 = vld [vmem:[#allocation5] sm:$0xff]  ;;  %v277_v4 = vld [vmem:[#allocation2] sm:$0xff]  ;;  %vm116_vm1 = vcmask 261120   ;;  %vm162_vm2 = vcmask 64512   ;;  %vm192_vm3 = vcmask 1043456  }
   0xe   :  { %v290_v5 = vld [vmem:[%s437_s2] ss:$0 sm:$0xff]  ;;  %s382_s2 = smov [#allocation7]   ;;  %s238_s28 = sshll.u32 %s438_s3, 4  ;;  %s239_s28 = int_to_ptr.hbm [resolvable:$true] %s238_s28 }
   0xf   :  { %s236_s25 = sshll.u32 %s382_s2, 4  ;;  %s383_s29 = smov 128   ;;  %s237_s25 = int_to_ptr.vmem [resolvable:$true] %s236_s25 }
  0x10   :  { %s384_s30 = smov 8  }
  0x11   :  { %100 = vmatpush.bf16.msra.mxu0 %v280_v1 }
  0x15   :  { %101 = vmatpush.bf16.msra.mxu0 %v279_v2 }
  0x19   :  { %102 = vmatpush.bf16.msra.mxu0 %v278_v3 }
  0x1c   :  { %272 = vmatmul.msk.bf16.vlgmr.msra.gmra.mxu0 %vm91_vm0, %v277_v4 }
  0x99   :  { %v104_v6 = vpop.f32.mrf.mxu0 }
  0x9a   :  { %v105_v7 = vadd.f32 %v290_v5, %v104_v6 }
  0x9c   :  { %v109_v8 = vpack.c.bf16 %v105_v7, %v105_v7 }
  0x9e   :  { %v112_v9 = vunpack.c.l.b16 %v109_v8 }
  0xa0   :  { %v113_v10 = vpack.c.b16 %v112_v9, %v112_v9 }
  0xa1   :  { %v106_v11 = vpop.f32.mrf.mxu0 }
  0xa2   :  { %v107_v12 = vadd.f32 %v290_v5, %v106_v11  ;;  %114 = vrot.lane.b32.xlu0 %v113_v10, %s381_s24 }
  0xa4   :  { %v110_v13 = vpack.c.bf16 %v107_v12, %v107_v12 }
  0xa6   :  { %v137_v14 = vunpack.c.l.b16 %v110_v13 }
  0xa8   :  { %v138_v15 = vpack.c.b16 %v137_v14, %v137_v14 }
  0xaa   :  { %139 = vrot.lane.b32.xlu0 %v138_v15, %s381_s24 }
 0x114   :  { %v115_v16 = vpop.permute.xlu0 %114 }
 0x115   :  { %v121_v17 = vsel %vm116_vm1, %v115_v16, 0 }
 0x116   :  { %130 = vmatpush.bf16.xpose.msra.mxu1 %v121_v17 }
 0x11c   :  { %v140_v18 = vpop.permute.xlu0 %139 }
 0x11d   :  { %273 = vmatmul.msk.bf16.vlgmr.msra.gmra.mxu1 %vm116_vm1, %v109_v8  ;;  %v145_v19 = vsel %vm116_vm1, %v140_v18, 0 }
 0x11e   :  { %154 = vmatpush.bf16.xpose.msra.mxu2 %v145_v19 }
 0x125   :  { %274 = vmatmul.msk.bf16.vlgmr.msra.gmra.mxu2 %vm116_vm1, %v110_v13 }
 0x19a   :  { %v132_v20 = vpop.f32.mrf.mxu1 }
 0x19b   :  { %v160_v21 = vmul.f32 0.17677669, %v132_v20 }
 0x19d   :  { %v163_v22 = vsel %vm162_vm2, %v160_v21, -inf }
 0x19e   :  { %164 = vmax.xlane.f32.xlu1 %v163_v22 }
 0x1a2   :  { %v134_v23 = vpop.f32.mrf.mxu1 }
 0x1a8   :  { %v156_v24 = vpop.f32.mrf.mxu2 }
 0x1a9   :  { %v161_v25 = vmul.f32 0.17677669, %v156_v24 }
 0x1ab   :  { %v166_v26 = vsel %vm162_vm2, %v161_v25, -inf }
 0x1ac   :  { %167 = vmax.xlane.f32.xlu1 %v166_v26 }
 0x1b0   :  { %v158_v27 = vpop.f32.mrf.mxu2 }
 0x1c5   :  { %209 = vrot.lane.b32.xlu1 %v138_v15, %s378_s20 }
 0x211   :  { %v165_v28 = vpop.xlane.xlu1 %164 }
 0x212   :  { %v169_v29 = vsub.f32 %v160_v21, %v165_v28 }
 0x214   :  { %v171_v30 = vmul.f32 1.442695, %v169_v29 }
 0x216   :  { %291 = vpow2.f32 %v171_v30 }
 0x21c   :  { %v292_v31 = vpop.eup %291 }
 0x21d   :  { %v175_v32 = vsel %vm162_vm2, %v292_v31, 0.0 }
 0x21e   :  { %176 = vadd.xlane.f32.xlu2 %v175_v32 }
 0x21f   :  { %v168_v33 = vpop.xlane.xlu1 %167 }
 0x220   :  { %v170_v34 = vsub.f32 %v161_v25, %v168_v33 }
 0x222   :  { %v173_v35 = vmul.f32 1.442695, %v170_v34 }
 0x224   :  { %293 = vpow2.f32 %v173_v35 }
 0x22a   :  { %v294_v36 = vpop.eup %293 }
 0x22b   :  { %v178_v37 = vsel %vm162_vm2, %v294_v36, 0.0 }
 0x22c   :  { %179 = vadd.xlane.f32.xlu0 %v178_v37 }
 0x236   :  { %187 = vrot.lane.b32.xlu2 %v113_v10, %s378_s20 }
 0x237   :  { %v210_v40 = vpop.permute.xlu1 %209 }
 0x238   :  { %v215_v44 = vsel %vm192_vm3, %v210_v40, 0 }
 0x291   :  { %v177_v38 = vpop.xlane.xlu2 %176 }
 0x292   :  { %295 = vrcp.f32 %v177_v38 }
 0x298   :  { %v296_v39 = vpop.eup %295 }
 0x299   :  { %v188_v41 = vpop.permute.xlu2 %187  ;;  %v183_v42 = vmul.f32 %v296_v39, %v292_v31 }
 0x29a   :  { %v194_v43 = vsel %vm192_vm3, %v188_v41, 0 }
 0x29b   :  { %203 = vmatpush.bf16.msra.mxu3 %v194_v43  ;;  %v185_v45 = vpack.c.bf16 %v183_v42, %v183_v42 }
 0x29e   :  { %275 = vmatmul.msk.bf16.vlgmr.msra.gmra.mxu3 %vm162_vm2, %v185_v45 }
 0x29f   :  { %224 = vmatpush.bf16.msrb.mxu3 %v215_v44  ;;  %v180_v46 = vpop.xlane.xlu0 %179 }
 0x2a0   :  { %297 = vrcp.f32 %v180_v46 }
 0x2a6   :  { %v298_v47 = vpop.eup %297 }
 0x2a7   :  { %v184_v48 = vmul.f32 %v298_v47, %v294_v36 }
 0x2a9   :  { %v186_v49 = vpack.c.bf16 %v184_v48, %v184_v48 }
 0x2ae   :  { %276 = vmatmul.msk.bf16.vlgmr.msrb.gmra.mxu3 %vm162_vm2, %v186_v49 }
 0x321   :  { %v205_v50 = vpop.f32.mrf.mxu3 }
 0x322   :  { %230 = vst.msk [vmem:[#allocation7] sm:$0xff] %vm116_vm1, %v205_v50 }
 0x329   :  { %v207_v51 = vpop.f32.mrf.mxu3 }
 0x331   :  { %v226_v52 = vpop.f32.mrf.mxu3 }
 0x332   :  { %231 = vst.msk [vmem:[#allocation7 + $0x8] sm:$0xff] %vm116_vm1, %v226_v52 }
 0x333   :  { %244 = dma.vmem_to_hbm [thread:$0]  %s237_s25, 256, %s239_s28, [#allocation4], %s383_s29, %s383_s29, %s384_s30  }
 0x339   :  { %v228_v53 = vpop.f32.mrf.mxu3 }
 0x33a   :  { %375 = dma.done.wait [#allocation4], 256  }
 0x33b   :  { %376 = vsyncadd [#allocation4], 4294967040 }
 0x33c   :  { %249 = vsyncpa [#allocation3], 1 }
 0x33d   :  { %250 = vsyncpa [#allocation6], 1 }
 0x33e   :  { %251 = vsyncpa [#allocation4], 1 }

</bundles_post_ra>
